<compile_context>
chip_gen: v6e
topology: v6e:2x2x1
jax: 0.10.0
libtpu: 0.0.40
codegen_flags: <defaults>
</compile_context>

<pallas_src>
import math

import jax
import jax.numpy as jnp
from jax.experimental import pallas as pl
from jax.experimental.pallas import tpu as pltpu

# ----------------------------- config (small) --------------------------------
B = 2            # batch
S = 8            # sequence length
E = 32           # hidden size
H = 4            # num heads
D = E // H       # head dim
INNER = 4 * E    # intermediate size
EPS = 1e-5
NEG_INF = float(jnp.finfo(jnp.float32).min)


def _layernorm(x, g, b):
    mu = jnp.mean(x, axis=-1, keepdims=True)
    var = jnp.mean((x - mu) ** 2, axis=-1, keepdims=True)
    return (x - mu) * jax.lax.rsqrt(var + EPS) * g + b


def _gelu_new(x):
    # 0.5 * x * (1 + tanh(sqrt(2/pi) * (x + 0.044715 * x^3)))
    return 0.5 * x * (1.0 + jnp.tanh(
        math.sqrt(2.0 / math.pi) * (x + 0.044715 * x * x * x)))


# ------------------------------- Pallas kernel --------------------------------
def gpt_neo_block_kernel(
    x_ref,                                   # (S, E) f32   (one batch element)
    ln1_g_ref, ln1_b_ref,                    # (1, E) f32
    wqkv_ref,                                # (E, 3E) bf16, [in, out], q|k|v
    wo_ref, bo_ref,                          # (E, E) bf16, (1, E) f32
    ln2_g_ref, ln2_b_ref,                    # (1, E) f32
    wfc_ref, bfc_ref,                        # (E, INNER) bf16, (1, INNER) f32
    wpr_ref, bpr_ref,                        # (INNER, E) bf16, (1, E) f32
    o_ref,                                   # (S, E)
):
    s_blk, e_dim = x_ref.shape
    x = x_ref[...].astype(jnp.float32)                       # (S, E)

    # ---- ln_1 ----
    h = _layernorm(x, ln1_g_ref[...], ln1_b_ref[...])
    h_bf = h.astype(jnp.bfloat16)

    # ---- fused q/k/v projection (no bias): one (S, 3E) matmul ----
    qkv = jnp.dot(h_bf, wqkv_ref[...], preferred_element_type=jnp.float32)

    # ---- plain (S, S) causal mask for this batch element ----
    row = jax.lax.broadcasted_iota(jnp.int32, (s_blk, s_blk), 0)
    col = jax.lax.broadcasted_iota(jnp.int32, (s_blk, s_blk), 1)
    causal = row >= col

    # ---- per-head attention with out_proj fused into the loop ----
    # GPT-Neo "eager": softmax_scale = 1.0, finfo(f32).min causal fill.
    # bf16 MXU operands, f32 accumulation everywhere.
    acc = jnp.zeros((s_blk, e_dim), jnp.float32)  # register accumulator
    for hh in range(H):                           # H small & static: unrolled
        q_sl = slice(hh * D, (hh + 1) * D)
        k_sl = slice(e_dim + hh * D, e_dim + (hh + 1) * D)
        v_sl = slice(2 * e_dim + hh * D, 2 * e_dim + (hh + 1) * D)
        qh = qkv[:, q_sl].astype(jnp.bfloat16)    # (S, D)
        kh = qkv[:, k_sl].astype(jnp.bfloat16)
        vh = qkv[:, v_sl].astype(jnp.bfloat16)
        scores = jax.lax.dot_general(             # q @ k^T, f32 accumulate
            qh, kh, (((1,), (1,)), ((), ())),
            preferred_element_type=jnp.float32)                     # (S, S)
        scores = jnp.where(causal, scores, NEG_INF)
        scores = scores - jnp.max(scores, axis=-1, keepdims=True)
        p = jnp.exp(scores)
        p = p * pl.reciprocal(jnp.sum(p, axis=-1, keepdims=True), approx=True)
        ctx = jnp.dot(p.astype(jnp.bfloat16), vh,
                      preferred_element_type=jnp.float32)           # (S, D)
        # fused out_proj: D-row slice of W_o, accumulate full-E-lane result.
        acc = acc + jnp.dot(ctx.astype(jnp.bfloat16), wo_ref[q_sl, :],
                            preferred_element_type=jnp.float32)     # (S, E)

    attn = acc + bo_ref[...]
    # resid_dropout: identity (eval)

    # ---- residual 1 ----
    h1 = attn + x

    # ---- ln_2 + MLP ----
    h2 = _layernorm(h1, ln2_g_ref[...], ln2_b_ref[...])
    ff = jnp.dot(h2.astype(jnp.bfloat16), wfc_ref[...],
                 preferred_element_type=jnp.float32) + bfc_ref[...]  # (S, INNER)
    ff = _gelu_new(ff)
    ff = jnp.dot(ff.astype(jnp.bfloat16), wpr_ref[...],
                 preferred_element_type=jnp.float32) + bpr_ref[...]  # (S, E)
    # mlp dropout: identity (eval)

    o_ref[...] = (h1 + ff).astype(o_ref.dtype)


# --------------------------------- wrapper ------------------------------------
def gpt_neo_block(x, params):
    Bx, Sx, Ex = x.shape
    x2 = x.reshape(Bx * Sx, Ex)                       # fold batch into rows

    to_row = lambda a: a.reshape(1, -1)               # 1-D -> (1, N)
    to_bf16 = lambda a: a.astype(jnp.bfloat16)

    wqkv = jnp.concatenate(
        [params["wq_t"], params["wk_t"], params["wv_t"]], axis=1)  # (E, 3E)

    inputs = [
        x2,
        to_row(params["ln1_g"]), to_row(params["ln1_b"]),
        to_bf16(wqkv),
        to_bf16(params["wo_t"]), to_row(params["bo"]),
        to_row(params["ln2_g"]), to_row(params["ln2_b"]),
        to_bf16(params["wfc_t"]), to_row(params["bfc"]),
        to_bf16(params["wpr_t"]), to_row(params["bpr"]),
    ]

    def resident(arr):
        # Full-array block, same block index on every grid step -> stays in
        # VMEM, no re-DMA per batch element.
        nd = arr.ndim
        return pl.BlockSpec(arr.shape, lambda b, _nd=nd: (0,) * _nd)

    in_specs = ([pl.BlockSpec((Sx, Ex), lambda b: (b, 0))]
                + [resident(a) for a in inputs[1:]])

    out2 = pl.pallas_call(
        gpt_neo_block_kernel,
        out_shape=jax.ShapeDtypeStruct((Bx * Sx, Ex), x.dtype),
        grid=(Bx,),
        in_specs=in_specs,
        out_specs=pl.BlockSpec((Sx, Ex), lambda b: (b, 0)),
        compiler_params=pltpu.CompilerParams(
            dimension_semantics=("parallel",)),
    )(*inputs)
    return out2.reshape(Bx, Sx, Ex)


# --------------------------- pure-JAX references --------------------------------
def gpt_neo_block_ref(x, p, mxu_dtype=jnp.float32):
    """Reference. mxu_dtype=bf16 mirrors the kernel's MXU-input casting."""
    cast = lambda a: a.astype(mxu_dtype)
    dot = lambda a, w: jnp.dot(cast(a), cast(w),
                               preferred_element_type=jnp.float32)
    x = x.astype(jnp.float32)
    h = _layernorm(x, p["ln1_g"], p["ln1_b"])
    q = dot(h, p["wq_t"])
    k = dot(h, p["wk_t"])
    v = dot(h, p["wv_t"])

    def split(t):  # (B,S,E) -> (B,H,S,D)
        return t.reshape(B, S, H, D).transpose(0, 2, 1, 3)

    q, k, v = split(q), split(k), split(v)
    scores = jnp.einsum("bhqd,bhkd->bhqk", cast(q), cast(k),
                        preferred_element_type=jnp.float32)    # no scaling
    causal = jnp.tril(jnp.ones((S, S), dtype=bool))
    scores = jnp.where(causal, scores, NEG_INF)
    p_attn = jax.nn.softmax(scores, axis=-1)
    attn = jnp.einsum("bhqk,bhkd->bhqd", cast(p_attn), cast(v),
                      preferred_element_type=jnp.float32)
    attn = attn.transpose(0, 2, 1, 3).reshape(B, S, E)
    attn = dot(attn, p["wo_t"]) + p["bo"]
    h1 = attn + x
    h2 = _layernorm(h1, p["ln2_g"], p["ln2_b"])
    ff = dot(_gelu_new(dot(h2, p["wfc_t"]) + p["bfc"]), p["wpr_t"]) + p["bpr"]
    return h1 + ff


# ----------------------------------- main --------------------------------------
if __name__ == "__main__":
    key = jax.random.PRNGKey(0)
    ks = jax.random.split(key, 16)

    def init(k, shape, scale=0.02):
        return (scale * jax.random.normal(k, shape)).astype(jnp.float32)

    params = {
        "ln1_g": jnp.ones((E,), jnp.float32),
        "ln1_b": jnp.zeros((E,), jnp.float32),
        "wq_t": init(ks[0], (E, E)),        # pre-transposed [in, out]
        "wk_t": init(ks[1], (E, E)),
        "wv_t": init(ks[2], (E, E)),
        "wo_t": init(ks[3], (E, E)),
        "bo":   init(ks[4], (E,)),
        "ln2_g": jnp.ones((E,), jnp.float32),
        "ln2_b": jnp.zeros((E,), jnp.float32),
        "wfc_t": init(ks[5], (E, INNER)),
        "bfc":   init(ks[6], (INNER,)),
        "wpr_t": init(ks[7], (INNER, E)),
        "bpr":   init(ks[8], (E,)),
    }

    x = jax.random.normal(ks[9], (B, S, E), dtype=jnp.float32)

    out = jax.block_until_ready(gpt_neo_block(x, params))
    assert out.shape == (B, S, E)

    # Tight check against a reference that mirrors the kernel's bf16 MXU inputs.
    ref_bf16 = jax.block_until_ready(
        gpt_neo_block_ref(x, params, mxu_dtype=jnp.bfloat16))
    err = jnp.max(jnp.abs(out - ref_bf16))
    assert jnp.allclose(out, ref_bf16, atol=2e-3, rtol=2e-3), \
        f"bf16-mirrored max err {err}"

    # Loose semantic check against the exact f32 module math
    # (difference comes only from bf16 weight/activation rounding on the MXU).
    ref_f32 = jax.block_until_ready(
        gpt_neo_block_ref(x, params, mxu_dtype=jnp.float32))
    err32 = jnp.max(jnp.abs(out - ref_f32))
    assert jnp.allclose(out, ref_f32, atol=5e-2, rtol=5e-2), \
        f"f32-semantics max err {err32}"

    print("KERNEL_OK")
</pallas_src>

<mosaic_0001>
module attributes {stable_mosaic.version = 11 : i64} {
  func.func @gpt_neo_block_kernel(%arg0: i32, %arg1: memref<8x32xf32, #tpu.memory_space<vmem>>, %arg2: memref<1x32xf32, #tpu.memory_space<vmem>>, %arg3: memref<1x32xf32, #tpu.memory_space<vmem>>, %arg4: memref<32x96xbf16, #tpu.memory_space<vmem>>, %arg5: memref<32x32xbf16, #tpu.memory_space<vmem>>, %arg6: memref<1x32xf32, #tpu.memory_space<vmem>>, %arg7: memref<1x32xf32, #tpu.memory_space<vmem>>, %arg8: memref<1x32xf32, #tpu.memory_space<vmem>>, %arg9: memref<32x128xbf16, #tpu.memory_space<vmem>>, %arg10: memref<1x128xf32, #tpu.memory_space<vmem>>, %arg11: memref<128x32xbf16, #tpu.memory_space<vmem>>, %arg12: memref<1x32xf32, #tpu.memory_space<vmem>>, %arg13: memref<8x32xf32, #tpu.memory_space<vmem>>) attributes {dimension_semantics = [#tpu.dimension_semantics<parallel>], iteration_bounds = array<i64: 2>, scalar_prefetch = 0 : i64, scratch_operands = 0 : i64, tpu.core_type = #tpu.core_type<tc>, window_params = [{transform_indices = @transform_0, window_bounds = array<i64: 8, 32>}, {pipeline_mode = #tpu.pipeline_mode<synchronous>, transform_indices = @transform_1, window_bounds = array<i64: 1, 32>}, {pipeline_mode = #tpu.pipeline_mode<synchronous>, transform_indices = @transform_2, window_bounds = array<i64: 1, 32>}, {pipeline_mode = #tpu.pipeline_mode<synchronous>, transform_indices = @transform_3, window_bounds = array<i64: 32, 96>}, {pipeline_mode = #tpu.pipeline_mode<synchronous>, transform_indices = @transform_4, window_bounds = array<i64: 32, 32>}, {pipeline_mode = #tpu.pipeline_mode<synchronous>, transform_indices = @transform_5, window_bounds = array<i64: 1, 32>}, {pipeline_mode = #tpu.pipeline_mode<synchronous>, transform_indices = @transform_6, window_bounds = array<i64: 1, 32>}, {pipeline_mode = #tpu.pipeline_mode<synchronous>, transform_indices = @transform_7, window_bounds = array<i64: 1, 32>}, {pipeline_mode = #tpu.pipeline_mode<synchronous>, transform_indices = @transform_8, window_bounds = array<i64: 32, 128>}, {pipeline_mode = #tpu.pipeline_mode<synchronous>, transform_indices = @transform_9, window_bounds = array<i64: 1, 128>}, {pipeline_mode = #tpu.pipeline_mode<synchronous>, transform_indices = @transform_10, window_bounds = array<i64: 128, 32>}, {pipeline_mode = #tpu.pipeline_mode<synchronous>, transform_indices = @transform_11, window_bounds = array<i64: 1, 32>}, {transform_indices = @transform_12, window_bounds = array<i64: 8, 32>}]} {
    %c0 = arith.constant 0 : index
    %c0_0 = arith.constant 0 : index
    %0 = vector.load %arg1[%c0, %c0_0] : memref<8x32xf32, #tpu.memory_space<vmem>>, vector<8x32xf32>
    %c0_1 = arith.constant 0 : index
    %c0_2 = arith.constant 0 : index
    %1 = vector.load %arg2[%c0_1, %c0_2] : memref<1x32xf32, #tpu.memory_space<vmem>>, vector<1x32xf32>
    %c0_3 = arith.constant 0 : index
    %c0_4 = arith.constant 0 : index
    %2 = vector.load %arg3[%c0_3, %c0_4] : memref<1x32xf32, #tpu.memory_space<vmem>>, vector<1x32xf32>
    %cst = arith.constant dense<0.000000e+00> : vector<8xf32>
    %3 = vector.multi_reduction <add>, %0, %cst [1] : vector<8x32xf32> to vector<8xf32>
    %4 = vector.shape_cast %3 : vector<8xf32> to vector<8x1xf32>
    %cst_5 = arith.constant 3.200000e+01 : f32
    %5 = vector.broadcast %cst_5 : f32 to vector<8x1xf32>
    %6 = arith.divf %4, %5 : vector<8x1xf32>
    %7 = vector.broadcast %6 : vector<8x1xf32> to vector<8x32xf32>
    %8 = arith.subf %0, %7 : vector<8x32xf32>
    %9 = arith.mulf %8, %8 : vector<8x32xf32>
    %cst_6 = arith.constant dense<0.000000e+00> : vector<8xf32>
    %10 = vector.multi_reduction <add>, %9, %cst_6 [1] : vector<8x32xf32> to vector<8xf32>
    %11 = vector.shape_cast %10 : vector<8xf32> to vector<8x1xf32>
    %cst_7 = arith.constant 3.200000e+01 : f32
    %12 = vector.broadcast %cst_7 : f32 to vector<8x1xf32>
    %13 = arith.divf %11, %12 : vector<8x1xf32>
    %14 = vector.broadcast %6 : vector<8x1xf32> to vector<8x32xf32>
    %15 = arith.subf %0, %14 : vector<8x32xf32>
    %cst_8 = arith.constant 9.99999974E-6 : f32
    %16 = vector.broadcast %cst_8 : f32 to vector<8x1xf32>
    %17 = arith.addf %13, %16 : vector<8x1xf32>
    %18 = math.rsqrt %17 : vector<8x1xf32>
    %19 = vector.broadcast %18 : vector<8x1xf32> to vector<8x32xf32>
    %20 = arith.mulf %15, %19 : vector<8x32xf32>
    %21 = vector.broadcast %1 : vector<1x32xf32> to vector<8x32xf32>
    %22 = arith.mulf %20, %21 : vector<8x32xf32>
    %23 = vector.broadcast %2 : vector<1x32xf32> to vector<8x32xf32>
    %24 = arith.addf %22, %23 : vector<8x32xf32>
    %25 = arith.truncf %24 : vector<8x32xf32> to vector<8x32xbf16>
    %c0_9 = arith.constant 0 : index
    %c0_10 = arith.constant 0 : index
    %26 = vector.load %arg4[%c0_9, %c0_10] : memref<32x96xbf16, #tpu.memory_space<vmem>>, vector<32x96xbf16>
    %cst_11 = arith.constant dense<0.000000e+00> : vector<8x96xf32>
    %27 = tpu.matmul %25, %26, %cst_11 {dimension_numbers = #tpu.dot_dimension_numbers<[1], [0], [0], [1], [0, 0, 1, 1], [], []>} : vector<8x32xbf16>, vector<32x96xbf16>, vector<8x96xf32> -> vector<8x96xf32>
    %28 = tpu.iota {dimensions = array<i32: 0>} : vector<8x8xi32>
    %29 = tpu.iota {dimensions = array<i32: 1>} : vector<8x8xi32>
    %30 = arith.cmpi sge, %28, %29 : vector<8x8xi32>
    %cst_12 = arith.constant 0.000000e+00 : f32
    %31 = vector.broadcast %cst_12 : f32 to vector<8x32xf32>
    %32 = vector.extract_strided_slice %27 {offsets = [0, 0], sizes = [8, 8], strides = [1, 1]} : vector<8x96xf32> to vector<8x8xf32>
    %33 = arith.truncf %32 : vector<8x8xf32> to vector<8x8xbf16>
    %34 = vector.extract_strided_slice %27 {offsets = [0, 32], sizes = [8, 8], strides = [1, 1]} : vector<8x96xf32> to vector<8x8xf32>
    %35 = arith.truncf %34 : vector<8x8xf32> to vector<8x8xbf16>
    %36 = vector.extract_strided_slice %27 {offsets = [0, 64], sizes = [8, 8], strides = [1, 1]} : vector<8x96xf32> to vector<8x8xf32>
    %37 = arith.truncf %36 : vector<8x8xf32> to vector<8x8xbf16>
    %cst_13 = arith.constant dense<0.000000e+00> : vector<8x8xf32>
    %38 = tpu.matmul %33, %35, %cst_13 {dimension_numbers = #tpu.dot_dimension_numbers<[1], [1], [0], [0], [0, 0, 1, 0], [], []>} : vector<8x8xbf16>, vector<8x8xbf16>, vector<8x8xf32> -> vector<8x8xf32>
    %cst_14 = arith.constant -3.40282347E+38 : f32
    %39 = vector.broadcast %cst_14 : f32 to vector<8x8xf32>
    %40 = arith.select %30, %38, %39 : vector<8x8xi1>, vector<8x8xf32>
    %cst_15 = arith.constant dense<0xFF800000> : vector<8xf32>
    %41 = vector.multi_reduction <maximumf>, %40, %cst_15 [1] : vector<8x8xf32> to vector<8xf32>
    %42 = vector.shape_cast %41 : vector<8xf32> to vector<8x1xf32>
    %43 = vector.broadcast %42 : vector<8x1xf32> to vector<8x8xf32>
    %44 = arith.subf %40, %43 : vector<8x8xf32>
    %45 = math.exp %44 : vector<8x8xf32>
    %cst_16 = arith.constant dense<0.000000e+00> : vector<8xf32>
    %46 = vector.multi_reduction <add>, %45, %cst_16 [1] : vector<8x8xf32> to vector<8xf32>
    %47 = vector.shape_cast %46 : vector<8xf32> to vector<8x1xf32>
    %48 = tpu.reciprocal %47 {approx = true} : vector<8x1xf32> -> vector<8x1xf32>
    %49 = vector.broadcast %48 : vector<8x1xf32> to vector<8x8xf32>
    %50 = arith.mulf %45, %49 : vector<8x8xf32>
    %51 = arith.truncf %50 : vector<8x8xf32> to vector<8x8xbf16>
    %cst_17 = arith.constant dense<0.000000e+00> : vector<8x8xf32>
    %52 = tpu.matmul %51, %37, %cst_17 {dimension_numbers = #tpu.dot_dimension_numbers<[1], [0], [0], [1], [0, 0, 1, 1], [], []>} : vector<8x8xbf16>, vector<8x8xbf16>, vector<8x8xf32> -> vector<8x8xf32>
    %53 = arith.truncf %52 : vector<8x8xf32> to vector<8x8xbf16>
    %c0_18 = arith.constant 0 : index
    %c0_19 = arith.constant 0 : index
    %54 = vector.load %arg5[%c0_18, %c0_19] : memref<32x32xbf16, #tpu.memory_space<vmem>>, vector<8x32xbf16>
    %cst_20 = arith.constant dense<0.000000e+00> : vector<8x32xf32>
    %55 = tpu.matmul %53, %54, %cst_20 {dimension_numbers = #tpu.dot_dimension_numbers<[1], [0], [0], [1], [0, 0, 1, 1], [], []>} : vector<8x8xbf16>, vector<8x32xbf16>, vector<8x32xf32> -> vector<8x32xf32>
    %56 = arith.addf %31, %55 : vector<8x32xf32>
    %57 = vector.extract_strided_slice %27 {offsets = [0, 8], sizes = [8, 8], strides = [1, 1]} : vector<8x96xf32> to vector<8x8xf32>
    %58 = arith.truncf %57 : vector<8x8xf32> to vector<8x8xbf16>
    %59 = vector.extract_strided_slice %27 {offsets = [0, 40], sizes = [8, 8], strides = [1, 1]} : vector<8x96xf32> to vector<8x8xf32>
    %60 = arith.truncf %59 : vector<8x8xf32> to vector<8x8xbf16>
    %61 = vector.extract_strided_slice %27 {offsets = [0, 72], sizes = [8, 8], strides = [1, 1]} : vector<8x96xf32> to vector<8x8xf32>
    %62 = arith.truncf %61 : vector<8x8xf32> to vector<8x8xbf16>
    %cst_21 = arith.constant dense<0.000000e+00> : vector<8x8xf32>
    %63 = tpu.matmul %58, %60, %cst_21 {dimension_numbers = #tpu.dot_dimension_numbers<[1], [1], [0], [0], [0, 0, 1, 0], [], []>} : vector<8x8xbf16>, vector<8x8xbf16>, vector<8x8xf32> -> vector<8x8xf32>
    %cst_22 = arith.constant -3.40282347E+38 : f32
    %64 = vector.broadcast %cst_22 : f32 to vector<8x8xf32>
    %65 = arith.select %30, %63, %64 : vector<8x8xi1>, vector<8x8xf32>
    %cst_23 = arith.constant dense<0xFF800000> : vector<8xf32>
    %66 = vector.multi_reduction <maximumf>, %65, %cst_23 [1] : vector<8x8xf32> to vector<8xf32>
    %67 = vector.shape_cast %66 : vector<8xf32> to vector<8x1xf32>
    %68 = vector.broadcast %67 : vector<8x1xf32> to vector<8x8xf32>
    %69 = arith.subf %65, %68 : vector<8x8xf32>
    %70 = math.exp %69 : vector<8x8xf32>
    %cst_24 = arith.constant dense<0.000000e+00> : vector<8xf32>
    %71 = vector.multi_reduction <add>, %70, %cst_24 [1] : vector<8x8xf32> to vector<8xf32>
    %72 = vector.shape_cast %71 : vector<8xf32> to vector<8x1xf32>
    %73 = tpu.reciprocal %72 {approx = true} : vector<8x1xf32> -> vector<8x1xf32>
    %74 = vector.broadcast %73 : vector<8x1xf32> to vector<8x8xf32>
    %75 = arith.mulf %70, %74 : vector<8x8xf32>
    %76 = arith.truncf %75 : vector<8x8xf32> to vector<8x8xbf16>
    %cst_25 = arith.constant dense<0.000000e+00> : vector<8x8xf32>
    %77 = tpu.matmul %76, %62, %cst_25 {dimension_numbers = #tpu.dot_dimension_numbers<[1], [0], [0], [1], [0, 0, 1, 1], [], []>} : vector<8x8xbf16>, vector<8x8xbf16>, vector<8x8xf32> -> vector<8x8xf32>
    %78 = arith.truncf %77 : vector<8x8xf32> to vector<8x8xbf16>
    %c8 = arith.constant 8 : index
    %c0_26 = arith.constant 0 : index
    %79 = vector.load %arg5[%c8, %c0_26] : memref<32x32xbf16, #tpu.memory_space<vmem>>, vector<8x32xbf16>
    %cst_27 = arith.constant dense<0.000000e+00> : vector<8x32xf32>
    %80 = tpu.matmul %78, %79, %cst_27 {dimension_numbers = #tpu.dot_dimension_numbers<[1], [0], [0], [1], [0, 0, 1, 1], [], []>} : vector<8x8xbf16>, vector<8x32xbf16>, vector<8x32xf32> -> vector<8x32xf32>
    %81 = arith.addf %56, %80 : vector<8x32xf32>
    %82 = vector.extract_strided_slice %27 {offsets = [0, 16], sizes = [8, 8], strides = [1, 1]} : vector<8x96xf32> to vector<8x8xf32>
    %83 = arith.truncf %82 : vector<8x8xf32> to vector<8x8xbf16>
    %84 = vector.extract_strided_slice %27 {offsets = [0, 48], sizes = [8, 8], strides = [1, 1]} : vector<8x96xf32> to vector<8x8xf32>
    %85 = arith.truncf %84 : vector<8x8xf32> to vector<8x8xbf16>
    %86 = vector.extract_strided_slice %27 {offsets = [0, 80], sizes = [8, 8], strides = [1, 1]} : vector<8x96xf32> to vector<8x8xf32>
    %87 = arith.truncf %86 : vector<8x8xf32> to vector<8x8xbf16>
    %cst_28 = arith.constant dense<0.000000e+00> : vector<8x8xf32>
    %88 = tpu.matmul %83, %85, %cst_28 {dimension_numbers = #tpu.dot_dimension_numbers<[1], [1], [0], [0], [0, 0, 1, 0], [], []>} : vector<8x8xbf16>, vector<8x8xbf16>, vector<8x8xf32> -> vector<8x8xf32>
    %cst_29 = arith.constant -3.40282347E+38 : f32
    %89 = vector.broadcast %cst_29 : f32 to vector<8x8xf32>
    %90 = arith.select %30, %88, %89 : vector<8x8xi1>, vector<8x8xf32>
    %cst_30 = arith.constant dense<0xFF800000> : vector<8xf32>
    %91 = vector.multi_reduction <maximumf>, %90, %cst_30 [1] : vector<8x8xf32> to vector<8xf32>
    %92 = vector.shape_cast %91 : vector<8xf32> to vector<8x1xf32>
    %93 = vector.broadcast %92 : vector<8x1xf32> to vector<8x8xf32>
    %94 = arith.subf %90, %93 : vector<8x8xf32>
    %95 = math.exp %94 : vector<8x8xf32>
    %cst_31 = arith.constant dense<0.000000e+00> : vector<8xf32>
    %96 = vector.multi_reduction <add>, %95, %cst_31 [1] : vector<8x8xf32> to vector<8xf32>
    %97 = vector.shape_cast %96 : vector<8xf32> to vector<8x1xf32>
    %98 = tpu.reciprocal %97 {approx = true} : vector<8x1xf32> -> vector<8x1xf32>
    %99 = vector.broadcast %98 : vector<8x1xf32> to vector<8x8xf32>
    %100 = arith.mulf %95, %99 : vector<8x8xf32>
    %101 = arith.truncf %100 : vector<8x8xf32> to vector<8x8xbf16>
    %cst_32 = arith.constant dense<0.000000e+00> : vector<8x8xf32>
    %102 = tpu.matmul %101, %87, %cst_32 {dimension_numbers = #tpu.dot_dimension_numbers<[1], [0], [0], [1], [0, 0, 1, 1], [], []>} : vector<8x8xbf16>, vector<8x8xbf16>, vector<8x8xf32> -> vector<8x8xf32>
    %103 = arith.truncf %102 : vector<8x8xf32> to vector<8x8xbf16>
    %c16 = arith.constant 16 : index
    %c0_33 = arith.constant 0 : index
    %104 = vector.load %arg5[%c16, %c0_33] : memref<32x32xbf16, #tpu.memory_space<vmem>>, vector<8x32xbf16>
    %cst_34 = arith.constant dense<0.000000e+00> : vector<8x32xf32>
    %105 = tpu.matmul %103, %104, %cst_34 {dimension_numbers = #tpu.dot_dimension_numbers<[1], [0], [0], [1], [0, 0, 1, 1], [], []>} : vector<8x8xbf16>, vector<8x32xbf16>, vector<8x32xf32> -> vector<8x32xf32>
    %106 = arith.addf %81, %105 : vector<8x32xf32>
    %107 = vector.extract_strided_slice %27 {offsets = [0, 24], sizes = [8, 8], strides = [1, 1]} : vector<8x96xf32> to vector<8x8xf32>
    %108 = arith.truncf %107 : vector<8x8xf32> to vector<8x8xbf16>
    %109 = vector.extract_strided_slice %27 {offsets = [0, 56], sizes = [8, 8], strides = [1, 1]} : vector<8x96xf32> to vector<8x8xf32>
    %110 = arith.truncf %109 : vector<8x8xf32> to vector<8x8xbf16>
    %111 = vector.extract_strided_slice %27 {offsets = [0, 88], sizes = [8, 8], strides = [1, 1]} : vector<8x96xf32> to vector<8x8xf32>
    %112 = arith.truncf %111 : vector<8x8xf32> to vector<8x8xbf16>
    %cst_35 = arith.constant dense<0.000000e+00> : vector<8x8xf32>
    %113 = tpu.matmul %108, %110, %cst_35 {dimension_numbers = #tpu.dot_dimension_numbers<[1], [1], [0], [0], [0, 0, 1, 0], [], []>} : vector<8x8xbf16>, vector<8x8xbf16>, vector<8x8xf32> -> vector<8x8xf32>
    %cst_36 = arith.constant -3.40282347E+38 : f32
    %114 = vector.broadcast %cst_36 : f32 to vector<8x8xf32>
    %115 = arith.select %30, %113, %114 : vector<8x8xi1>, vector<8x8xf32>
    %cst_37 = arith.constant dense<0xFF800000> : vector<8xf32>
    %116 = vector.multi_reduction <maximumf>, %115, %cst_37 [1] : vector<8x8xf32> to vector<8xf32>
    %117 = vector.shape_cast %116 : vector<8xf32> to vector<8x1xf32>
    %118 = vector.broadcast %117 : vector<8x1xf32> to vector<8x8xf32>
    %119 = arith.subf %115, %118 : vector<8x8xf32>
    %120 = math.exp %119 : vector<8x8xf32>
    %cst_38 = arith.constant dense<0.000000e+00> : vector<8xf32>
    %121 = vector.multi_reduction <add>, %120, %cst_38 [1] : vector<8x8xf32> to vector<8xf32>
    %122 = vector.shape_cast %121 : vector<8xf32> to vector<8x1xf32>
    %123 = tpu.reciprocal %122 {approx = true} : vector<8x1xf32> -> vector<8x1xf32>
    %124 = vector.broadcast %123 : vector<8x1xf32> to vector<8x8xf32>
    %125 = arith.mulf %120, %124 : vector<8x8xf32>
    %126 = arith.truncf %125 : vector<8x8xf32> to vector<8x8xbf16>
    %cst_39 = arith.constant dense<0.000000e+00> : vector<8x8xf32>
    %127 = tpu.matmul %126, %112, %cst_39 {dimension_numbers = #tpu.dot_dimension_numbers<[1], [0], [0], [1], [0, 0, 1, 1], [], []>} : vector<8x8xbf16>, vector<8x8xbf16>, vector<8x8xf32> -> vector<8x8xf32>
    %128 = arith.truncf %127 : vector<8x8xf32> to vector<8x8xbf16>
    %c24 = arith.constant 24 : index
    %c0_40 = arith.constant 0 : index
    %129 = vector.load %arg5[%c24, %c0_40] : memref<32x32xbf16, #tpu.memory_space<vmem>>, vector<8x32xbf16>
    %cst_41 = arith.constant dense<0.000000e+00> : vector<8x32xf32>
    %130 = tpu.matmul %128, %129, %cst_41 {dimension_numbers = #tpu.dot_dimension_numbers<[1], [0], [0], [1], [0, 0, 1, 1], [], []>} : vector<8x8xbf16>, vector<8x32xbf16>, vector<8x32xf32> -> vector<8x32xf32>
    %131 = arith.addf %106, %130 : vector<8x32xf32>
    %c0_42 = arith.constant 0 : index
    %c0_43 = arith.constant 0 : index
    %132 = vector.load %arg6[%c0_42, %c0_43] : memref<1x32xf32, #tpu.memory_space<vmem>>, vector<1x32xf32>
    %133 = vector.broadcast %132 : vector<1x32xf32> to vector<8x32xf32>
    %134 = arith.addf %131, %133 : vector<8x32xf32>
    %135 = arith.addf %134, %0 : vector<8x32xf32>
    %c0_44 = arith.constant 0 : index
    %c0_45 = arith.constant 0 : index
    %136 = vector.load %arg7[%c0_44, %c0_45] : memref<1x32xf32, #tpu.memory_space<vmem>>, vector<1x32xf32>
    %c0_46 = arith.constant 0 : index
    %c0_47 = arith.constant 0 : index
    %137 = vector.load %arg8[%c0_46, %c0_47] : memref<1x32xf32, #tpu.memory_space<vmem>>, vector<1x32xf32>
    %cst_48 = arith.constant dense<0.000000e+00> : vector<8xf32>
    %138 = vector.multi_reduction <add>, %135, %cst_48 [1] : vector<8x32xf32> to vector<8xf32>
    %139 = vector.shape_cast %138 : vector<8xf32> to vector<8x1xf32>
    %cst_49 = arith.constant 3.200000e+01 : f32
    %140 = vector.broadcast %cst_49 : f32 to vector<8x1xf32>
    %141 = arith.divf %139, %140 : vector<8x1xf32>
    %142 = vector.broadcast %141 : vector<8x1xf32> to vector<8x32xf32>
    %143 = arith.subf %135, %142 : vector<8x32xf32>
    %144 = arith.mulf %143, %143 : vector<8x32xf32>
    %cst_50 = arith.constant dense<0.000000e+00> : vector<8xf32>
    %145 = vector.multi_reduction <add>, %144, %cst_50 [1] : vector<8x32xf32> to vector<8xf32>
    %146 = vector.shape_cast %145 : vector<8xf32> to vector<8x1xf32>
    %cst_51 = arith.constant 3.200000e+01 : f32
    %147 = vector.broadcast %cst_51 : f32 to vector<8x1xf32>
    %148 = arith.divf %146, %147 : vector<8x1xf32>
    %149 = vector.broadcast %141 : vector<8x1xf32> to vector<8x32xf32>
    %150 = arith.subf %135, %149 : vector<8x32xf32>
    %cst_52 = arith.constant 9.99999974E-6 : f32
    %151 = vector.broadcast %cst_52 : f32 to vector<8x1xf32>
    %152 = arith.addf %148, %151 : vector<8x1xf32>
    %153 = math.rsqrt %152 : vector<8x1xf32>
    %154 = vector.broadcast %153 : vector<8x1xf32> to vector<8x32xf32>
    %155 = arith.mulf %150, %154 : vector<8x32xf32>
    %156 = vector.broadcast %136 : vector<1x32xf32> to vector<8x32xf32>
    %157 = arith.mulf %155, %156 : vector<8x32xf32>
    %158 = vector.broadcast %137 : vector<1x32xf32> to vector<8x32xf32>
    %159 = arith.addf %157, %158 : vector<8x32xf32>
    %160 = arith.truncf %159 : vector<8x32xf32> to vector<8x32xbf16>
    %c0_53 = arith.constant 0 : index
    %c0_54 = arith.constant 0 : index
    %161 = vector.load %arg9[%c0_53, %c0_54] : memref<32x128xbf16, #tpu.memory_space<vmem>>, vector<32x128xbf16>
    %cst_55 = arith.constant dense<0.000000e+00> : vector<8x128xf32>
    %162 = tpu.matmul %160, %161, %cst_55 {dimension_numbers = #tpu.dot_dimension_numbers<[1], [0], [0], [1], [0, 0, 1, 1], [], []>} : vector<8x32xbf16>, vector<32x128xbf16>, vector<8x128xf32> -> vector<8x128xf32>
    %c0_56 = arith.constant 0 : index
    %c0_57 = arith.constant 0 : index
    %163 = vector.load %arg10[%c0_56, %c0_57] : memref<1x128xf32, #tpu.memory_space<vmem>>, vector<1x128xf32>
    %164 = vector.broadcast %163 : vector<1x128xf32> to vector<8x128xf32>
    %165 = arith.addf %162, %164 : vector<8x128xf32>
    %cst_58 = arith.constant 5.000000e-01 : f32
    %166 = vector.broadcast %cst_58 : f32 to vector<8x128xf32>
    %167 = arith.mulf %166, %165 : vector<8x128xf32>
    %cst_59 = arith.constant 4.471500e-02 : f32
    %168 = vector.broadcast %cst_59 : f32 to vector<8x128xf32>
    %169 = arith.mulf %168, %165 : vector<8x128xf32>
    %170 = arith.mulf %169, %165 : vector<8x128xf32>
    %171 = arith.mulf %170, %165 : vector<8x128xf32>
    %172 = arith.addf %165, %171 : vector<8x128xf32>
    %cst_60 = arith.constant 0.797884583 : f32
    %173 = vector.broadcast %cst_60 : f32 to vector<8x128xf32>
    %174 = arith.mulf %173, %172 : vector<8x128xf32>
    %175 = math.tanh %174 : vector<8x128xf32>
    %cst_61 = arith.constant 1.000000e+00 : f32
    %176 = vector.broadcast %cst_61 : f32 to vector<8x128xf32>
    %177 = arith.addf %176, %175 : vector<8x128xf32>
    %178 = arith.mulf %167, %177 : vector<8x128xf32>
    %179 = arith.truncf %178 : vector<8x128xf32> to vector<8x128xbf16>
    %c0_62 = arith.constant 0 : index
    %c0_63 = arith.constant 0 : index
    %180 = vector.load %arg11[%c0_62, %c0_63] : memref<128x32xbf16, #tpu.memory_space<vmem>>, vector<128x32xbf16>
    %cst_64 = arith.constant dense<0.000000e+00> : vector<8x32xf32>
    %181 = tpu.matmul %179, %180, %cst_64 {dimension_numbers = #tpu.dot_dimension_numbers<[1], [0], [0], [1], [0, 0, 1, 1], [], []>} : vector<8x128xbf16>, vector<128x32xbf16>, vector<8x32xf32> -> vector<8x32xf32>
    %c0_65 = arith.constant 0 : index
    %c0_66 = arith.constant 0 : index
    %182 = vector.load %arg12[%c0_65, %c0_66] : memref<1x32xf32, #tpu.memory_space<vmem>>, vector<1x32xf32>
    %183 = vector.broadcast %182 : vector<1x32xf32> to vector<8x32xf32>
    %184 = arith.addf %181, %183 : vector<8x32xf32>
    %185 = arith.addf %135, %184 : vector<8x32xf32>
    %c0_67 = arith.constant 0 : index
    %c0_68 = arith.constant 0 : index
    %186 = vector.load %arg13[%c0_67, %c0_68] : memref<8x32xf32, #tpu.memory_space<vmem>>, vector<8x32xf32>
    tpu.vector_store %arg13[%c0_67, %c0_68], %185 {strides = array<i32>} : memref<8x32xf32, #tpu.memory_space<vmem>>, vector<8x32xf32>,
    return
  }
  func.func @transform_0(%arg0: i32) -> (i32, i32) {
    %c0_i32 = arith.constant 0 : i32
    %c0_i32_0 = arith.constant 0 : i32
    return %arg0, %c0_i32 : i32, i32
  }
  func.func @transform_1(%arg0: i32) -> (i32, i32) {
    %c0_i32 = arith.constant 0 : i32
    %c0_i32_0 = arith.constant 0 : i32
    %c0_i32_1 = arith.constant 0 : i32
    return %c0_i32, %c0_i32_0 : i32, i32
  }
  func.func @transform_2(%arg0: i32) -> (i32, i32) {
    %c0_i32 = arith.constant 0 : i32
    %c0_i32_0 = arith.constant 0 : i32
    %c0_i32_1 = arith.constant 0 : i32
    return %c0_i32, %c0_i32_0 : i32, i32
  }
  func.func @transform_3(%arg0: i32) -> (i32, i32) {
    %c0_i32 = arith.constant 0 : i32
    %c0_i32_0 = arith.constant 0 : i32
    %c0_i32_1 = arith.constant 0 : i32
    return %c0_i32, %c0_i32_0 : i32, i32
  }
  func.func @transform_4(%arg0: i32) -> (i32, i32) {
    %c0_i32 = arith.constant 0 : i32
    %c0_i32_0 = arith.constant 0 : i32
    %c0_i32_1 = arith.constant 0 : i32
    return %c0_i32, %c0_i32_0 : i32, i32
  }
  func.func @transform_5(%arg0: i32) -> (i32, i32) {
    %c0_i32 = arith.constant 0 : i32
    %c0_i32_0 = arith.constant 0 : i32
    %c0_i32_1 = arith.constant 0 : i32
    return %c0_i32, %c0_i32_0 : i32, i32
  }
  func.func @transform_6(%arg0: i32) -> (i32, i32) {
    %c0_i32 = arith.constant 0 : i32
    %c0_i32_0 = arith.constant 0 : i32
    %c0_i32_1 = arith.constant 0 : i32
    return %c0_i32, %c0_i32_0 : i32, i32
  }
  func.func @transform_7(%arg0: i32) -> (i32, i32) {
    %c0_i32 = arith.constant 0 : i32
    %c0_i32_0 = arith.constant 0 : i32
    %c0_i32_1 = arith.constant 0 : i32
    return %c0_i32, %c0_i32_0 : i32, i32
  }
  func.func @transform_8(%arg0: i32) -> (i32, i32) {
    %c0_i32 = arith.constant 0 : i32
    %c0_i32_0 = arith.constant 0 : i32
    %c0_i32_1 = arith.constant 0 : i32
    return %c0_i32, %c0_i32_0 : i32, i32
  }
  func.func @transform_9(%arg0: i32) -> (i32, i32) {
    %c0_i32 = arith.constant 0 : i32
    %c0_i32_0 = arith.constant 0 : i32
    %c0_i32_1 = arith.constant 0 : i32
    return %c0_i32, %c0_i32_0 : i32, i32
  }
  func.func @transform_10(%arg0: i32) -> (i32, i32) {
    %c0_i32 = arith.constant 0 : i32
    %c0_i32_0 = arith.constant 0 : i32
    %c0_i32_1 = arith.constant 0 : i32
    return %c0_i32, %c0_i32_0 : i32, i32
  }
  func.func @transform_11(%arg0: i32) -> (i32, i32) {
    %c0_i32 = arith.constant 0 : i32
    %c0_i32_0 = arith.constant 0 : i32
    %c0_i32_1 = arith.constant 0 : i32
    return %c0_i32, %c0_i32_0 : i32, i32
  }
  func.func @transform_12(%arg0: i32) -> (i32, i32) {
    %c0_i32 = arith.constant 0 : i32
    %c0_i32_0 = arith.constant 0 : i32
    return %arg0, %c0_i32 : i32, i32
  }
}

</mosaic_0001>

<bundles_post_ra>
// kernel: tpu_custom_call.1
= control target key start
LH: loop header
LB: loop body
LE: loop exit
PB: predicated region body
PF: predicated region fallthrough
CT: control target
= control target key end

     0   :  { %s2174_s0 = inlined_call_operand.vmem [shape: f32[16,32], index: 0, kind: input, shape index: {}]   ;;  %s2175_s1 = inlined_call_operand.vmem [shape: f32[1,32], index: 1, kind: input, shape index: {}]   ;;  %s2176_s2 = inlined_call_operand.vmem [shape: f32[1,32], index: 2, kind: input, shape index: {}]   ;;  %s2177_s3 = inlined_call_operand.vmem [shape: bf16[32,96], index: 3, kind: input, shape index: {}]   ;;  %s2178_s4 = inlined_call_operand.vmem [shape: bf16[32,32], index: 4, kind: input, shape index: {}]   ;;  %s2179_s5 = inlined_call_operand.vmem [shape: f32[1,32], index: 5, kind: input, shape index: {}]   ;;  %s2180_s6 = inlined_call_operand.vmem [shape: f32[1,32], index: 6, kind: input, shape index: {}]   ;;  %s2181_s7 = inlined_call_operand.vmem [shape: f32[1,32], index: 7, kind: input, shape index: {}]   ;;  %s2182_s8 = inlined_call_operand.vmem [shape: bf16[32,128], index: 8, kind: input, shape index: {}]   ;;  %s2183_s9 = inlined_call_operand.vmem [shape: f32[1,128], index: 9, kind: input, shape index: {}]   ;;  %s2184_s10 = inlined_call_operand.vmem [shape: bf16[128,32], index: 10, kind: input, shape index: {}]   ;;  %s2185_s11 = inlined_call_operand.vmem [shape: f32[1,32], index: 11, kind: input, shape index: {}]   ;;  %s2186_s12 = inlined_call_operand.hbm [shape: f32[16,32], index: 12, kind: output, shape index: {}]  }
   0x1   :  { %2187 = sst [smem:[#allocation5_spill]] %s2174_s0 }
   0x2   :  { %2188 = sst [smem:[#allocation6_spill]] %s2175_s1 }
   0x3   :  { %17 = vsyncpa [#allocation3], 0 }
   0x4   :  { %19 = vsyncpa [#allocation3 + $0x1], 0  ;;  %s1865_s21 = smov 0   ;;  %s1867_s22 = smov 0  }
   0x5   :  { %s1869_s23 = smov 0   ;;  %s1871_s24 = smov 0  }
   0x6 LB: > { %s1886_s25 = sadd.s32 4294967295, %s1784_s24   ;;  %s1448_s26 = sadd.s32 4294967294, %s1784_s24   ;;  %s1784_s24 = sphi %s1871_s24, %s2196_s24   ;;  %s1780_s23 = sphi %s1869_s23, %s2195_s23   ;;  %s1776_s22 = sphi %s1867_s22, %s2194_s22   ;;  %s1772_s21 = sphi %s1865_s21, %s2193_s21  }
   0x7   : > { %s1890_s27 = sadd.s32 1, %s1784_s24   ;;  %s289_s28 = sadd.s32 1, %s1780_s23 }
   0x8   : > { %s286_s29 = ssub.s32 %s1784_s24, %s1890_s27  ;;  %p299_p0 = scmp.ne.s32.totalorder %s1780_s23, %s1776_s22 }
   0x9   : > { %p287_p1 = scmp.eq.s32.totalorder %s286_s29, 0  ;;  %p300_p2 = scmp.eq.s32.totalorder %s1886_s25, 1 }
   0xa   : > { %p305_p3 = scmp.ne.s32.totalorder %s1776_s22, %s1772_s21  ;;  %p306_p4 = scmp.eq.s32.totalorder %s1448_s26, 1 }
   0xb   : > { %s1901_s30 = scalar_select %p287_p1, %s1780_s23, %s289_s28  }
   0xc   : > { %p1903_p5 = por %p300_p2, %p299_p0  ;;  %p1907_p6 = por %p306_p4, %p305_p3 }
   0xd   : > { %p1451_p7 = scmp.ge.s32.totalorder %s1784_s24, 1  ;;  %p364_p8 = scmp.lt.s32.totalorder %s1784_s24, 3 }
   0xf   : > { %p365_p9 = pnand %p1451_p7, %p364_p8 }
  0x10   : > { %p405_p10 = scmp.lt.s32.totalorder (!%p365_p9), %s1886_s25, 1  ;;  %s2191_s0 = sld [smem:[#allocation5_spill]] (!%p365_p9) }
  0x11   : > { %368 = sbr.rel (%p365_p9) target bundleno = 4046 (0xfce), region = 68  ;;  %s2192_s1 = sld [smem:[#allocation6_spill]] (!%p365_p9) }
  0x12   : > { %s1789_s20 = smov (!%p365_p9), 96   ;;  %s1790_s26 = smov (!%p365_p9), 88  }
  0x13   : > { %s1791_s28 = smov (!%p365_p9), 120   ;;  %s1792_s29 = smov (!%p365_p9), 56  }
  0x14   : > { %s1795_s17 = smov (!%p365_p9), 48  }
  0x16   : > { %s406_s15 = scalar_select %p405_p10, %s1886_s25, 1  ;;  %vm413_vm0 = vcmask 261120   ;;  %v1690_v7 = vld [vmem:[%s2177_s3 + $0x8] sm:$0xff]   ;;  %v1786_v8 = vmov 0.0   ;;  %vm1787_vm1 = vmmov 0   ;;  %v1691_v9 = vld [vmem:[%s2177_s3] sm:$0xff]   ;;  %v502_v29 = vlaneseq }
  0x17   : > { %1530 = vmatprep.subr.bf16.mxu1 %v1786_v8  ;;  %1534 = vmatprep.mubr.msk.bf16.mxu1 %vm1787_vm1, %v1786_v8  ;;  %v1454_v14 = vld [vmem:[%s2192_s1] ss:$0 sm:$0xff]  ;;  %vm511_vm2 = vcmask 64512   ;;  %vm576_vm3 = vcmask 1043456  }
  0x18   : > { %s1453_s16 = sshll.u32 %s406_s15, 3  ;;  %1531 = vmatpush3.bf16.msra.mxu1 %v1690_v7  ;;  %1556 = vmatprep.subr.bf16.mxu0 %v1786_v8  ;;  %v1455_v16 = vld [vmem:[%s2176_s2] ss:$0 sm:$0xff]  ;;  %v1959_v30 = vshrl.u32 %v502_v29, 7  ;;  %v1961_v31 = vand.u32 127, %v502_v29  ;;  %s1793_s15 = smov 80  }
  0x19   : > { %s408_s19 = scalar_lea.vmem %s2191_s0, %s1453_s16  ;;  %1532 = vmatprep.subr.bf16.mxu1 %v1786_v8  ;;  %1558 = vmatprep.mubr.msk.bf16.mxu0 %vm1787_vm1, %v1786_v8  ;;  %s1794_s16 = smov 112  }
  0x1a   : > { %v1918_v0 = vld [vmem:[%s408_s19] sm:$0xff]  ;;  %s1788_s19 = smov 64   ;;  %vm506_vm4 = vcmp.ge.s32.totalorder %v1959_v30, %v1961_v31 }
  0x1b   : > { %v414_v1 = vsel %vm413_vm0, %v1918_v0, 0.0 }
  0x1c   : > { %415 = vadd.xlane.f32.xlu0 %v414_v1  ;;  %1533 = vmatpush3.bf16.msra.mxu1 %v1691_v9  ;;  %v621_v9 = vld [vmem:[%s2178_s4] sm:$0xf] }
  0x1d   : > { %1538 = vmatprep.subr.bf16.mxu1 %v1786_v8 }
  0xa5   : > { %v416_v2 = vpop.xlane.xlu0 %415 }
  0xa6   : > { %v418_v3 = vmul.f32 0.03125, %v416_v2 }
  0xa8   : > { %v419_v4 = vsub.f32 %v1918_v0, %v418_v3 }
  0xaa   : > { %v420_v5 = vmul.f32 %v419_v4, %v419_v4 }
  0xac   : > { %v421_v6 = vsel %vm413_vm0, %v420_v5, 0.0 }
  0xad   : > { %422 = vadd.xlane.f32.xlu0 %v421_v6 }
 0x136   : > { %v423_v10 = vpop.xlane.xlu0 %422 }
 0x137   : > { %v424_v11 = vmul.f32 0.03125, %v423_v10 }
 0x139   : > { %v425_v12 = vadd.f32 1e-05, %v424_v11 }
 0x13b   : > { %1702 = vrsqrt.f32 %v425_v12  ;;  %v785_v12 = vsel %vm576_vm3, %v621_v9, 0 }
 0x148   : > { %v1703_v13 = vpop.eup %1702 }
 0x149   : > { %v427_v15 = vmul.f32 %v1703_v13, %v419_v4  ;;  %v734_v4 = vld [vmem:[%s2178_s4 + $0x4] sm:$0xf] }
 0x14a   : > { %v739_v5 = vsel %vm576_vm3, %v734_v4, 0 }
 0x14b   : > { %v434_v17 = vmul.f32 %v1454_v14, %v427_v15 }
 0x14d   : > { %v441_v18 = vadd.f32 %v1455_v16, %v434_v17 }
 0x14f   : > { %v442_v19 = vpack.c.bf16 %v441_v18, %v441_v18 }
 0x151   : > { %1535 = vmatmul.mubr.msk.bf16.vlgmr.msra.gmra.mxu1 %vm413_vm0, %v442_v19 }
 0x152   : > { %1540 = vmatprep.mubr.msk.bf16.mxu1 %vm1787_vm1, %v1786_v8 }
 0x211   : > { %v496_v20 = vpop.f32.mrf.mxu1 }
 0x212   : > { %v1947_v21 = vpack.c.bf16 %v496_v20, %v496_v20 }
 0x213   : > { %v1536_v22 = vpop.f32.mrf.mxu1 }
 0x214   : > { %571 = vrot.lane.b32.xlu0 %v1947_v21, %s1788_s19  ;;  %509 = vrot.lane.b32.xlu1 %v1947_v21, %s1789_s20 }
 0x215   : > { %v499_v23 = vpop.f32.mrf.mxu1 }
 0x217   : > { %v1537_v24 = vpop.f32.mrf.mxu1 }
 0x286   : > { %v510_v25 = vpop.permute.xlu1 %509  ;;  %v572_v27 = vpop.permute.xlu0 %571 }
 0x287   : > { %v516_v26 = vsel %vm511_vm2, %v510_v25, 0  ;;  %v578_v28 = vsel %vm576_vm3, %v572_v27, 0 }
 0x288   : > { %1539 = vmatpush3.bf16.xpose.msra.mxu1 %v516_v26 }
 0x289   : > { %1544 = vmatprep.subr.bf16.mxu1 %v1786_v8 }
 0x28f   : > { %1541 = vmatmul.mubr.msk.bf16.vlgmr.msra.gmra.mxu1 %vm511_vm2, %v1947_v21 }
 0x290   : > { %1545 = vmatpush3.bf16.msra.mxu1 %v578_v28  ;;  %1546 = vmatprep.mubr.msk.bf16.mxu1 %vm1787_vm1, %v1786_v8 }
 0x291   : > { %1550 = vmatprep.subr.bf16.mxu1 %v1786_v8 }
 0x34f   : > { %v552_v32 = vpop.f32.mrf.mxu1 }
 0x350   : > { %v558_v33 = vsel %vm506_vm4, %v552_v32, -3.4028235e+38 }
 0x351   : > { %v1542_v34 = vpop.f32.mrf.mxu1  ;;  %v559_v35 = vsel %vm511_vm2, %v558_v33, -inf }
 0x352   : > { %560 = vmax.xlane.f32.xlu1 %v559_v35 }
 0x353   : > { %v555_v36 = vpop.f32.mrf.mxu1 }
 0x355   : > { %v1543_v37 = vpop.f32.mrf.mxu1 }
 0x3db   : > { %v561_v38 = vpop.xlane.xlu1 %560 }
 0x3dc   : > { %v562_v39 = vsub.f32 %v558_v33, %v561_v38 }
 0x3de   : > { %v563_v40 = vmul.f32 1.442695, %v562_v39 }
 0x3e0   : > { %1704 = vpow2.f32 %v563_v40 }
 0x3ed   : > { %v1705_v41 = vpop.eup %1704 }
 0x3ee   : > { %v565_v42 = vsel %vm511_vm2, %v1705_v41, 0.0 }
 0x3ef   : > { %566 = vadd.xlane.f32.xlu0 %v565_v42 }
 0x405   : > { %624 = vrot.lane.b32.xlu0 %v1947_v21, %s1790_s26  ;;  %s402_s26 = sand.u32 1, %s1776_s22  }
 0x409   : > { %622 = vrot.lane.b32.xlu0 %v1947_v21, %s1791_s28  ;;  %s1796_s28 = smov 72  }
 0x478   : > { %v567_v43 = vpop.xlane.xlu0 %566 }
 0x479   : > { %1706 = vrcp.f32 %v567_v43 }
 0x47c   : > { %v625_v46 = vpop.permute.xlu0 %624 }
 0x47d   : > { %v630_v48 = vsel %vm511_vm2, %v625_v46, 0 }
 0x480   : > { %v623_v49 = vpop.permute.xlu0 %622 }
 0x486   : > { %v1707_v44 = vpop.eup %1706 }
 0x487   : > { %v569_v45 = vmul.f32 %v1707_v44, %v1705_v41 }
 0x489   : > { %v570_v47 = vpack.c.bf16 %v569_v45, %v569_v45 }
 0x48b   : > { %1547 = vmatmul.mubr.msk.bf16.vlgmr.msra.gmra.mxu1 %vm511_vm2, %v570_v47 }
 0x48c   : > { %1551 = vmatpush3.bf16.xpose.msra.mxu1 %v630_v48  ;;  %1552 = vmatprep.mubr.msk.bf16.mxu1 %vm1787_vm1, %v1786_v8 }
 0x48d   : > { %1562 = vmatprep.subr.bf16.mxu1 %v1786_v8 }
 0x493   : > { %1553 = vmatmul.mubr.msk.bf16.vlgmr.msra.gmra.mxu1 %vm511_vm2, %v623_v49 }
 0x494   : > { %1564 = vmatprep.mubr.msk.bf16.mxu1 %vm1787_vm1, %v1786_v8  ;;  %1563 = vmatpush3.bf16.msra.mxu1 %v739_v5 }
 0x495   : > { %1574 = vmatprep.subr.bf16.mxu1 %v1786_v8 }
 0x54b   : > { %v614_v50 = vpop.f32.mrf.mxu1 }
 0x54c   : > { %v620_v14 = vpack.c.bf16 %v614_v50, %v614_v50 }
 0x54d   : > { %v1548_v51 = vpop.f32.mrf.mxu1 }
 0x54f   : > { %v617_v52 = vpop.f32.mrf.mxu1 }
 0x551   : > { %v1549_v53 = vpop.f32.mrf.mxu1 }
 0x552   : > { %v939_v53 = vld [vmem:[%s2178_s4 + $0x8] sm:$0xf] }
 0x553   : > { %v666_v54 = vpop.f32.mrf.mxu1 }
 0x554   : > { %v672_v55 = vsel %vm506_vm4, %v666_v54, -3.4028235e+38  ;;  %v944_v54 = vsel %vm576_vm3, %v939_v53, 0  ;;  %v1694_v53 = vld [vmem:[%s2184_s10 + $0x38] sm:$0xff]  }
 0x555   : > { %v1554_v56 = vpop.f32.mrf.mxu1  ;;  %v673_v57 = vsel %vm511_vm2, %v672_v55, -inf }
 0x556   : > { %674 = vmax.xlane.f32.xlu1 %v673_v57 }
 0x557   : > { %v669_v58 = vpop.f32.mrf.mxu1 }
 0x559   : > { %v1555_v59 = vpop.f32.mrf.mxu1 }
 0x567   : > { %685 = vrot.lane.b32.xlu1 %v1947_v21, %s1792_s29  ;;  %s1797_s29 = smov 104  }
 0x56b   : > { %829 = vrot.lane.b32.xlu1 %v1947_v21, %s1793_s15 }
 0x56f   : > { %827 = vrot.lane.b32.xlu1 %v1947_v21, %s1794_s16  ;;  %s1488_s16 = sshll.u32 %s1886_s25, 7  ;;  %s1376_s25 = scalar_lea.sflag [#allocation3], %s402_s26 }
 0x570   : > { %s2132_s0 = scalar_lea.hbm %s2186_s12, %s1488_s16 }
 0x5df   : > { %v675_v60 = vpop.xlane.xlu1 %674 }
 0x5e0   : > { %v676_v61 = vsub.f32 %v672_v55, %v675_v60 }
 0x5e2   : > { %v677_v62 = vmul.f32 1.442695, %v676_v61 }
 0x5e3   : > { %v686_v63 = vpop.permute.xlu1 %685 }
 0x5e4   : > { %1708 = vpow2.f32 %v677_v62  ;;  %v691_v1 = vsel %vm576_vm3, %v686_v63, 0 }
 0x5e5   : > { %1557 = vmatpush3.bf16.msra.mxu0 %v691_v1 }
 0x5e6   : > { %1568 = vmatprep.subr.bf16.mxu0 %v1786_v8 }
 0x5e7   : > { %v830_v16 = vpop.permute.xlu1 %829 }
 0x5e8   : > { %v835_v20 = vsel %vm511_vm2, %v830_v16, 0 }
 0x5eb   : > { %v828_v25 = vpop.permute.xlu1 %827 }
 0x5f1   : > { %v1709_v2 = vpop.eup %1708 }
 0x5f2   : > { %v679_v3 = vsel %vm511_vm2, %v1709_v2, 0.0 }
 0x5f3   : > { %680 = vadd.xlane.f32.xlu0 %v679_v3 }
 0x609   : > { %890 = vrot.lane.b32.xlu0 %v1947_v21, %s1795_s17  ;;  %s1798_s17 = smov 40  }
 0x67c   : > { %v681_v6 = vpop.xlane.xlu0 %680 }
 0x67d   : > { %1710 = vrcp.f32 %v681_v6 }
 0x680   : > { %v891_v13 = vpop.permute.xlu0 %890 }
 0x681   : > { %v896_v15 = vsel %vm576_vm3, %v891_v13, 0 }
 0x68a   : > { %v1711_v7 = vpop.eup %1710 }
 0x68b   : > { %v683_v10 = vmul.f32 %v1711_v7, %v1709_v2 }
 0x68d   : > { %v684_v11 = vpack.c.bf16 %v683_v10, %v683_v10 }
 0x68f   : > { %1559 = vmatmul.mubr.msk.bf16.vlgmr.msra.gmra.mxu0 %vm511_vm2, %v684_v11 }
 0x690   : > { %1569 = vmatpush3.bf16.msra.mxu0 %v785_v12  ;;  %1570 = vmatprep.mubr.msk.bf16.mxu0 %vm1787_vm1, %v1786_v8 }
 0x691   : > { %1580 = vmatprep.subr.bf16.mxu0 %v1786_v8 }
 0x697   : > { %1571 = vmatmul.mubr.msk.bf16.vlgmr.msra.gmra.mxu0 %vm511_vm2, %v620_v14 }
 0x698   : > { %1581 = vmatpush3.bf16.msra.mxu0 %v896_v15  ;;  %1582 = vmatprep.mubr.msk.bf16.mxu0 %vm1787_vm1, %v1786_v8 }
 0x699   : > { %1592 = vmatprep.subr.bf16.mxu0 %v1786_v8 }
 0x74f   : > { %v727_v17 = vpop.f32.mrf.mxu0 }
 0x750   : > { %v733_v18 = vpack.c.bf16 %v727_v17, %v727_v17 }
 0x751   : > { %v1560_v19 = vpop.f32.mrf.mxu0 }
 0x752   : > { %1565 = vmatmul.mubr.msk.bf16.vlgmr.msra.gmra.mxu1 %vm511_vm2, %v733_v18 }
 0x753   : > { %1575 = vmatpush3.bf16.xpose.msra.mxu1 %v835_v20  ;;  %v730_v22 = vpop.f32.mrf.mxu0  ;;  %1576 = vmatprep.mubr.msk.bf16.mxu1 %vm1787_vm1, %v1786_v8 }
 0x754   : > { %1586 = vmatprep.subr.bf16.mxu1 %v1786_v8 }
 0x755   : > { %v1561_v23 = vpop.f32.mrf.mxu0 }
 0x757   : > { %v2014_v24 = vpop.f32.mrf.mxu0 }
 0x759   : > { %v1572_v26 = vpop.f32.mrf.mxu0 }
 0x75a   : > { %1577 = vmatmul.mubr.msk.bf16.vlgmr.msra.gmra.mxu1 %vm511_vm2, %v828_v25 }
 0x75b   : > { %v824_v27 = vpop.f32.mrf.mxu0  ;;  %1588 = vmatprep.mubr.msk.bf16.mxu1 %vm1787_vm1, %v1786_v8  ;;  %1587 = vmatpush3.bf16.msra.mxu1 %v944_v54  ;;  %v1695_v54 = vld [vmem:[%s2184_s10 + $0x30] sm:$0xff]  }
 0x75c   : > { %1598 = vmatprep.subr.bf16.mxu1 %v1786_v8  ;;  %v1471_v27 = vld [vmem:[%s2179_s5] ss:$0 sm:$0xff] }
 0x75d   : > { %v1573_v28 = vpop.f32.mrf.mxu0 }
 0x812   : > { %v2019_v29 = vpop.f32.mrf.mxu1 }
 0x813   : > { %v822_v9 = vadd.f32 %v2014_v24, %v2019_v29 }
 0x814   : > { %v1566_v32 = vpop.f32.mrf.mxu1 }
 0x816   : > { %v778_v33 = vpop.f32.mrf.mxu1 }
 0x818   : > { %v1567_v34 = vpop.f32.mrf.mxu1 }
 0x81a   : > { %v871_v35 = vpop.f32.mrf.mxu1 }
 0x81b   : > { %v877_v36 = vsel %vm506_vm4, %v871_v35, -3.4028235e+38 }
 0x81c   : > { %v1578_v37 = vpop.f32.mrf.mxu1  ;;  %v878_v38 = vsel %vm511_vm2, %v877_v36, -inf }
 0x81d   : > { %879 = vmax.xlane.f32.xlu1 %v878_v38 }
 0x81e   : > { %v874_v39 = vpop.f32.mrf.mxu1 }
 0x820   : > { %v1579_v40 = vpop.f32.mrf.mxu1 }
 0x8a6   : > { %v880_v41 = vpop.xlane.xlu1 %879 }
 0x8a7   : > { %v881_v42 = vsub.f32 %v877_v36, %v880_v41 }
 0x8a9   : > { %v882_v43 = vmul.f32 1.442695, %v881_v42  ;;  %v1692_v42 = vld [vmem:[%s2182_s8 + $0x8] sm:$0xff]  }
 0x8ab   : > { %1712 = vpow2.f32 %v882_v43 }
 0x8b8   : > { %v1713_v44 = vpop.eup %1712 }
 0x8b9   : > { %v884_v45 = vsel %vm511_vm2, %v1713_v44, 0.0 }
 0x8ba   : > { %885 = vadd.xlane.f32.xlu0 %v884_v45 }
 0x8d0   : > { %989 = vrot.lane.b32.xlu0 %v1947_v21, %s1796_s28  ;;  %s1452_s28 = sshll.u32 %s402_s26, 3 }
 0x8d4   : > { %987 = vrot.lane.b32.xlu0 %v1947_v21, %s1797_s29  ;;  %s1799_s29 = smov [#allocation2]  }
 0x8d5   : > { %s1728_s15 = sshll.u32 %s1799_s29, 4  ;;  %s1729_s15 = int_to_ptr.vmem [resolvable:$false] %s1728_s15 }
 0x8d6   : > { %s1730_s16 = scalar_lea.vmem %s1729_s15, 256 }
 0x943   : > { %v886_v46 = vpop.xlane.xlu0 %885 }
 0x944   : > { %1714 = vrcp.f32 %v886_v46 }
 0x947   : > { %v990_v49 = vpop.permute.xlu0 %989 }
 0x948   : > { %v995_v51 = vsel %vm511_vm2, %v990_v49, 0  ;;  %v1473_v49 = vld [vmem:[%s2181_s7] ss:$0 sm:$0xff] }
 0x94b   : > { %v988_v52 = vpop.permute.xlu0 %987 }
 0x951   : > { %v1715_v47 = vpop.eup %1714 }
 0x952   : > { %v888_v48 = vmul.f32 %v1715_v47, %v1713_v44  ;;  %v1472_v47 = vld [vmem:[%s2180_s6] ss:$0 sm:$0xff] }
 0x954   : > { %v889_v50 = vpack.c.bf16 %v888_v48, %v888_v48 }
 0x956   : > { %1583 = vmatmul.mubr.msk.bf16.vlgmr.msra.gmra.mxu0 %vm511_vm2, %v889_v50 }
 0x957   : > { %1593 = vmatpush3.bf16.xpose.msra.mxu0 %v995_v51  ;;  %1594 = vmatprep.mubr.msk.bf16.mxu0 %vm1787_vm1, %v1786_v8 }
 0x958   : > { %1604 = vmatprep.subr.bf16.mxu0 %v1786_v8 }
 0x95e   : > { %1595 = vmatmul.mubr.msk.bf16.vlgmr.msra.gmra.mxu0 %vm511_vm2, %v988_v52 }
 0x95f   : > { %1606 = vmatprep.mubr.msk.bf16.mxu0 %vm1787_vm1, %v1786_v8 }
 0xa16   : > { %v932_v55 = vpop.f32.mrf.mxu0 }
 0xa17   : > { %v938_v56 = vpack.c.bf16 %v932_v55, %v932_v55  ;;  %v1696_v55 = vld [vmem:[%s2184_s10 + $0x28] sm:$0xff]  }
 0xa18   : > { %v1584_v57 = vpop.f32.mrf.mxu0 }
 0xa19   : > { %1589 = vmatmul.mubr.msk.bf16.vlgmr.msra.gmra.mxu1 %vm511_vm2, %v938_v56  ;;  %v1697_v56 = vld [vmem:[%s2184_s10 + $0x20] sm:$0xff]   ;;  %v1698_v57 = vld [vmem:[%s2184_s10 + $0x18] sm:$0xff]  }
 0xa1a   : > { %v935_v58 = vpop.f32.mrf.mxu0  ;;  %1600 = vmatprep.mubr.msk.bf16.mxu1 %vm1787_vm1, %v1786_v8 }
 0xa1b   : > { %v1699_v58 = vld [vmem:[%s2184_s10 + $0x10] sm:$0xff]  }
 0xa1c   : > { %v1585_v59 = vpop.f32.mrf.mxu0 }
 0xa1d   : > { %v1700_v59 = vld [vmem:[%s2184_s10 + $0x8] sm:$0xff]  }
 0xa1e   : > { %v1031_v60 = vpop.f32.mrf.mxu0 }
 0xa1f   : > { %v1037_v61 = vsel %vm506_vm4, %v1031_v60, -3.4028235e+38  ;;  %v1701_v60 = vld [vmem:[%s2184_s10] sm:$0xff]  }
 0xa20   : > { %v1596_v62 = vpop.f32.mrf.mxu0  ;;  %v1038_v63 = vsel %vm511_vm2, %v1037_v61, -inf }
 0xa21   : > { %1039 = vmax.xlane.f32.xlu1 %v1038_v63 }
 0xa22   : > { %v1034_v1 = vpop.f32.mrf.mxu0 }
 0xa24   : > { %v1597_v2 = vpop.f32.mrf.mxu0 }
 0xa32   : > { %1050 = vrot.lane.b32.xlu1 %v1947_v21, %s1798_s17  ;;  %v1099_v21 = vld [vmem:[%s2178_s4 + $0xc] sm:$0xf]  ;;  %s404_s17 = scalar_lea.vmem [#allocation2], %s1452_s28 }
 0xa33   : > { %v1104_v13 = vsel %vm576_vm3, %v1099_v21, 0  ;;  %v1478_v21 = vld [vmem:[%s2185_s11] ss:$0 sm:$0xff]  ;;  %s1389_s18 = sshll.u32 %s404_s17, 4  ;;  %s2134_s18 = int_to_ptr.vmem [resolvable:$true] %s1389_s18 }
 0xa34   : > { %1605 = vmatpush3.bf16.msra.mxu0 %v1104_v13  ;;  %s1724_s28 = scalar_lea.vmem %s2134_s18, 128  ;;  %p1731_p0 = scmp.lt.s32.totalorder %s2134_s18, %s1729_s15 }
 0xa35   : > { %1618 = vmatprep.subr.bf16.mxu0 %v1786_v8  ;;  %p1725_p11 = scmp.ne.s32.totalorder %s2134_s18, %s1724_s28  ;;  %p1732_p1 = scmp.lt.s32.totalorder %s1730_s16, %s1724_s28 }
 0xa37   : > { %p1726_p12 = pnand %p1725_p11, %p1903_p5  ;;  %p1733_p2 = por %p1732_p1, %p1731_p0 }
 0xa39   : > { %p1727_p13 = pneg %p1726_p12 }
 0xa3b   : > { %p1734_p3 = pnand %p1733_p2, %p1727_p13 }
 0xaaa   : > { %v1040_v3 = vpop.xlane.xlu1 %1039 }
 0xaab   : > { %v1041_v4 = vsub.f32 %v1037_v61, %v1040_v3  ;;  %v1474_v61 = vld [vmem:[%s2183_s9] ss:$0 sm:$0xff] }
 0xaad   : > { %v1042_v5 = vmul.f32 1.442695, %v1041_v4 }
 0xaae   : > { %v1051_v6 = vpop.permute.xlu1 %1050 }
 0xaaf   : > { %1716 = vpow2.f32 %v1042_v5  ;;  %v1056_v7 = vsel %vm576_vm3, %v1051_v6, 0 }
 0xab0   : > { %1599 = vmatpush3.bf16.msra.mxu1 %v1056_v7 }
 0xab1   : > { %1610 = vmatprep.subr.bf16.mxu1 %v1786_v8 }
 0xabc   : > { %v1717_v30 = vpop.eup %1716 }
 0xabd   : > { %v1044_v31 = vsel %vm511_vm2, %v1717_v30, 0.0 }
 0xabe   : > { %1045 = vadd.xlane.f32.xlu0 %v1044_v31 }
 0xad9   : > { %v980_v10 = vpop.f32.mrf.mxu1 }
 0xada   : > { %v986_v11 = vadd.f32 %v980_v10, %v822_v9 }
 0xadb   : > { %v1590_v12 = vpop.f32.mrf.mxu1 }
 0xadd   : > { %v983_v14 = vpop.f32.mrf.mxu1 }
 0xadf   : > { %v1591_v15 = vpop.f32.mrf.mxu1 }
 0xb47   : > { %v1046_v16 = vpop.xlane.xlu0 %1045 }
 0xb48   : > { %1718 = vrcp.f32 %v1046_v16 }
 0xb55   : > { %v1719_v17 = vpop.eup %1718 }
 0xb56   : > { %v1048_v18 = vmul.f32 %v1719_v17, %v1717_v30 }
 0xb58   : > { %v1049_v19 = vpack.c.bf16 %v1048_v18, %v1048_v18 }
 0xb5a   : > { %1601 = vmatmul.mubr.msk.bf16.vlgmr.msra.gmra.mxu1 %vm511_vm2, %v1049_v19 }
 0xb5b   : > { %1614 = vmatprep.mubr.msk.bf16.mxu1 %vm1787_vm1, %v1786_v8  ;;  %1611 = vmatpush3.bf16.msra.mxu1 %v1692_v42 }
 0xb5c   : > { %1612 = vmatprep.subr.bf16.mxu1 %v1786_v8 }
 0xc1a   : > { %v1092_v20 = vpop.f32.mrf.mxu1 }
 0xc1b   : > { %v1098_v22 = vpack.c.bf16 %v1092_v20, %v1092_v20 }
 0xc1c   : > { %v1602_v23 = vpop.f32.mrf.mxu1 }
 0xc1d   : > { %1607 = vmatmul.mubr.msk.bf16.vlgmr.msra.gmra.mxu0 %vm511_vm2, %v1098_v22 }
 0xc1e   : > { %v1095_v24 = vpop.f32.mrf.mxu1  ;;  %1634 = vmatprep.mubr.msk.bf16.mxu0 %vm1787_vm1, %v1786_v8  ;;  %1619 = vmatpush3.bf16.msra.mxu0 %v1694_v53 }
 0xc1f   : > { %1620 = vmatprep.subr.bf16.mxu0 %v1786_v8 }
 0xc20   : > { %v1603_v25 = vpop.f32.mrf.mxu1 }
 0xc22   : > { %1621 = vmatpush3.bf16.msra.mxu0 %v1695_v54 }
 0xc23   : > { %1622 = vmatprep.subr.bf16.mxu0 %v1786_v8 }
 0xc26   : > { %1623 = vmatpush3.bf16.msra.mxu0 %v1696_v55 }
 0xc27   : > { %1624 = vmatprep.subr.bf16.mxu0 %v1786_v8 }
 0xc2a   : > { %1625 = vmatpush3.bf16.msra.mxu0 %v1697_v56 }
 0xc2b   : > { %1626 = vmatprep.subr.bf16.mxu0 %v1786_v8 }
 0xc2e   : > { %1627 = vmatpush3.bf16.msra.mxu0 %v1698_v57 }
 0xc2f   : > { %1628 = vmatprep.subr.bf16.mxu0 %v1786_v8 }
 0xc32   : > { %1629 = vmatpush3.bf16.msra.mxu0 %v1699_v58 }
 0xc33   : > { %1630 = vmatprep.subr.bf16.mxu0 %v1786_v8 }
 0xc36   : > { %1631 = vmatpush3.bf16.msra.mxu0 %v1700_v59 }
 0xc37   : > { %1632 = vmatprep.subr.bf16.mxu0 %v1786_v8 }
 0xc3a   : > { %1633 = vmatpush3.bf16.msra.mxu0 %v1701_v60 }
 0xcdd   : > { %v1140_v26 = vpop.f32.mrf.mxu0 }
 0xcde   : > { %v1146_v28 = vadd.f32 %v1140_v26, %v986_v11 }
 0xcdf   : > { %v1608_v29 = vpop.f32.mrf.mxu0 }
 0xce0   : > { %v1154_v32 = vadd.f32 %v1471_v27, %v1146_v28 }
 0xce1   : > { %v1143_v33 = vpop.f32.mrf.mxu0 }
 0xce2   : > { %v2069_v34 = vadd.f32 %v1154_v32, %v1918_v0  ;;  %v1693_v0 = vld [vmem:[%s2182_s8] sm:$0xff]  }
 0xce3   : > { %v1609_v35 = vpop.f32.mrf.mxu0  ;;  %1613 = vmatpush3.bf16.msra.mxu1 %v1693_v0 }
 0xce4   : > { %v1158_v36 = vsel %vm413_vm0, %v2069_v34, 0.0 }
 0xce5   : > { %1159 = vadd.xlane.f32.xlu1 %v1158_v36 }
 0xd6e   : > { %v1160_v37 = vpop.xlane.xlu1 %1159 }
 0xd6f   : > { %v1161_v38 = vmul.f32 0.03125, %v1160_v37 }
 0xd71   : > { %v1162_v39 = vsub.f32 %v2069_v34, %v1161_v38 }
 0xd73   : > { %v1163_v40 = vmul.f32 %v1162_v39, %v1162_v39 }
 0xd75   : > { %v1164_v41 = vsel %vm413_vm0, %v1163_v40, 0.0 }
 0xd76   : > { %1165 = vadd.xlane.f32.xlu0 %v1164_v41 }
 0xdff   : > { %v1166_v43 = vpop.xlane.xlu0 %1165 }
 0xe00   : > { %v1167_v44 = vmul.f32 0.03125, %v1166_v43 }
 0xe02   : > { %v1168_v45 = vadd.f32 1e-05, %v1167_v44 }
 0xe04   : > { %1720 = vrsqrt.f32 %v1168_v45 }
 0xe11   : > { %v1721_v46 = vpop.eup %1720 }
 0xe12   : > { %v1170_v48 = vmul.f32 %v1721_v46, %v1162_v39 }
 0xe14   : > { %v1177_v50 = vmul.f32 %v1472_v47, %v1170_v48 }
 0xe16   : > { %v1184_v51 = vadd.f32 %v1473_v49, %v1177_v50 }
 0xe18   : > { %v1185_v52 = vpack.c.bf16 %v1184_v51, %v1184_v51 }
 0xe1a   : > { %1615 = vmatmul.mubr.msk.bf16.vlgmr.msra.gmra.mxu1 %vm413_vm0, %v1185_v52 }
 0xeda   : > { %v1246_v62 = vpop.f32.mrf.mxu1 }
 0xedb   : > { %v1247_v63 = vadd.f32 %v1474_v61, %v1246_v62 }
 0xedc   : > { %v1616_v1 = vpop.f32.mrf.mxu1 }
 0xedd   : > { %v1253_v2 = vmul.f32 0.044715, %v1247_v63  ;;  %v1252_v8 = vmul.f32 0.5, %v1247_v63 }
 0xede   : > { %v1249_v3 = vpop.f32.mrf.mxu1 }
 0xedf   : > { %v1254_v4 = vmul.f32 %v1253_v2, %v1247_v63 }
 0xee0   : > { %v1617_v5 = vpop.f32.mrf.mxu1 }
 0xee1   : > { %v1255_v6 = vmul.f32 %v1254_v4, %v1247_v63 }
 0xee3   : > { %v1256_v7 = vadd.f32 %v1255_v6, %v1247_v63 }
 0xee5   : > { %v1257_v30 = vmul.f32 0.7978846, %v1256_v7 }
 0xee7   : > { %1722 = vtanh.f32 %v1257_v30 }
 0xef4   : > { %v1723_v31 = vpop.eup %1722 }
 0xef5   : > { %v1259_v9 = vadd.f32 1.0, %v1723_v31 }
 0xef7   : > { %v1260_v10 = vmul.f32 %v1259_v9, %v1252_v8 }
 0xef9   : > { %v1261_v11 = vpack.c.bf16 %v1260_v10, %v1260_v10 }
 0xefb   : > { %1635 = vmatmul.mubr.bf16.vlgmr.msra.gmra.mxu0 %v1261_v11 }
 0xfbb   : > { %v1367_v12 = vpop.f32.mrf.mxu0 }
 0xfbc   : > { %v1368_v13 = vadd.f32 %v1478_v21, %v1367_v12 }
 0xfbd   : > { %v1636_v14 = vpop.f32.mrf.mxu0 }
 0xfbe   : > { %v1373_v15 = vadd.f32 %v1368_v13, %v2069_v34 }
 0xfbf   : > { %v1370_v16 = vpop.f32.mrf.mxu0 }
 0xfc0   : > { %1374 = vst.msk [vmem:[%s404_s17] sm:$0xff] %vm413_vm0, %v1373_v15 }
 0xfc1   : > { %v1637_v17 = vpop.f32.mrf.mxu0 }
 0xfc2   : > { %1737 = shalt.err (!%p1734_p3)
}
 0xfc3   : > { %s1738_s17 = scalar_lea.hbm %s2132_s0, 128  ;;  %s1742_s20 = scalar_lea.hbm %s2186_s12, 256 }
 0xfc4   : > { %p1739_p4 = scmp.ne.s32.totalorder %s2132_s0, %s1738_s17  ;;  %p1743_p9 = scmp.lt.s32.totalorder %s2132_s0, %s2186_s12 }
 0xfc5   : > { %p1744_p10 = scmp.lt.s32.totalorder %s1742_s20, %s1738_s17 }
 0xfc6   : > { %p1740_p7 = pnand %p1739_p4, %p1903_p5 }
 0xfc7   : > { %p1745_p11 = por %p1744_p10, %p1743_p9 }
 0xfc8   : > { %p1741_p8 = pneg %p1740_p7 }
 0xfca   : > { %p1746_p12 = pnand %p1745_p11, %p1741_p8 }
 0xfcc   : > { %1749 = shalt.err (!%p1746_p12)
}
 0xfcd   : > { %1638 = dma.vmem_to_hbm [thread:$0]  (%p1903_p5), %s2134_s18, 128, %s2132_s0, %s1376_s25  }
 0xfce PF: > { %p1644_p13 = scmp.ge.s32.totalorder %s1784_s24, 2  ;;  %s1401_s28 = sand.u32 1, %s1772_s21  }
 0xfcf   : > { %s1402_s1 = scalar_lea.sflag [#allocation3], %s1401_s28 }
 0xfd0   : > { %p1641_p0 = pnand %p1644_p13, %p1907_p6 }
 0xfd2   : > { %p1642_p1 = pneg %p1641_p0 }
 0xfd4   : > { %1767 = dma.done.wait (%p1642_p1), %s1402_s1, 128  }
 0xfd5   : > { %1769 = vsyncadd (%p1642_p1), %s1402_s1, 4294967168  ;;  %p22_p2 = scmp.ge.s32.totalorder %s1890_s27, 4   ;;  %s2193_s21 = smov %s1776_s22 }
 0xfd6   : > { %s2194_s22 = smov %s1780_s23  ;;  %s2195_s23 = smov %s1901_s30 }
 0xfd7   : > { %s2196_s24 = smov %s1890_s27  ;;  %24 = sbr.rel (!%p22_p2) target bundleno = 6 (0x6), region = 103 }
 0xfdc   :  { %1407 = vsyncpa [#allocation3], 1 }
 0xfdd   :  { %1409 = vsyncpa [#allocation3 + $0x1], 1 }

</bundles_post_ra>
